<compile_context>
chip_gen: v7x
topology: tpu7x:2x2x1
jax: 0.10.0
libtpu: 0.0.40
codegen_flags: <defaults>
</compile_context>

<pallas_src>
import functools

import jax
import jax.numpy as jnp
import numpy as np
from jax.experimental import pallas as pl
from jax.experimental.pallas import tpu as pltpu

NEG_SLOPE = 0.1
TM_MAX = 256   # M row tile for the im2col GEMM (multiple of 8; MXU-sized)
LANE = 128     # lane width: K and Cout are padded to multiples of this


def _round_up(x, m):
    return ((x + m - 1) // m) * m


# ----------------------------------------------------------------------------
# Pallas kernel: fused (im2col-rows @ weight) + bias + optional LeakyReLU
# ----------------------------------------------------------------------------
def _gemm_bias_act_kernel(x_ref, w_ref, b_ref, o_ref, *, leaky):
    # x_ref: (TM, Kp) bf16   w_ref: (Kp, Cp) bf16   b_ref: (1, Cp) f32
    # o_ref: (TM, Cp) bf16 or f32
    acc = jnp.dot(x_ref[...], w_ref[...], preferred_element_type=jnp.float32)
    acc = acc + b_ref[...]                       # f32 epilogue (broadcast rows)
    if leaky:
        acc = jnp.where(acc > 0, acc, NEG_SLOPE * acc)
    o_ref[...] = acc.astype(o_ref.dtype)


def _gemm_bias_act(x_rows, w_mat, bias, leaky, out_dtype):
    """x_rows: (M, K), w_mat: (K, Cout), bias: (Cout,) -> (M, Cout) out_dtype."""
    M, K = x_rows.shape
    Cout = w_mat.shape[1]

    # Lane-dense padding: K and Cout up to multiples of 128 (zero-filled).
    Kp = _round_up(K, LANE)
    Cp = _round_up(Cout, LANE)
    # Row tile: as large as 256, multiple of 8; pad M up to a tile multiple.
    tm = min(TM_MAX, _round_up(M, 8))
    Mp = _round_up(M, tm)

    x_p = jnp.pad(x_rows.astype(jnp.bfloat16), ((0, Mp - M), (0, Kp - K)))
    w_p = jnp.pad(w_mat.astype(jnp.bfloat16), ((0, Kp - K), (0, Cp - Cout)))
    b_p = jnp.pad(bias.astype(jnp.float32), (0, Cp - Cout)).reshape(1, Cp)

    out_itemsize = jnp.dtype(out_dtype).itemsize
    cost = pl.CostEstimate(
        flops=int(2 * Mp * Kp * Cp),
        transcendentals=0,
        bytes_accessed=int(Mp * Kp * 2 + Kp * Cp * 2 + Cp * 4 + Mp * Cp * out_itemsize),
    )

    out = pl.pallas_call(
        functools.partial(_gemm_bias_act_kernel, leaky=leaky),
        out_shape=jax.ShapeDtypeStruct((Mp, Cp), out_dtype),
        grid=(Mp // tm,),
        in_specs=[
            pl.BlockSpec((tm, Kp), lambda i: (i, 0)),    # row tile of im2col matrix
            pl.BlockSpec((Kp, Cp), lambda i: (0, 0)),    # full weight, resident
            pl.BlockSpec((1, Cp), lambda i: (0, 0)),     # bias
        ],
        out_specs=pl.BlockSpec((tm, Cp), lambda i: (i, 0)),
        compiler_params=pltpu.CompilerParams(
            dimension_semantics=("parallel",)),
        cost_estimate=cost,
    )(x_p, w_p, b_p)
    return out[:M, :Cout]


# ----------------------------------------------------------------------------
# Conv layer = glue (pad / im2col / reshape) + Pallas GEMM kernel
# ----------------------------------------------------------------------------
def _im2col(x_nhwc, kh, kw, stride, pad):
    x = jnp.pad(x_nhwc, ((0, 0), (pad, pad), (pad, pad), (0, 0)))
    N, Hp, Wp, C = x.shape
    Ho = (Hp - kh) // stride + 1
    Wo = (Wp - kw) // stride + 1
    cols = []
    for i in range(kh):
        for j in range(kw):
            patch = x[:, i:i + (Ho - 1) * stride + 1:stride,
                      j:j + (Wo - 1) * stride + 1:stride, :]
            cols.append(patch)  # (N, Ho, Wo, C)
    cols = jnp.concatenate(cols, axis=-1)           # (N, Ho, Wo, kh*kw*C)
    return cols.reshape(N * Ho * Wo, kh * kw * C), Ho, Wo


def conv2d_pallas(x_nhwc, weight_oihw, bias, stride, pad, leaky, out_dtype):
    """weight_oihw: PyTorch layout (Cout, Cin, KH, KW)."""
    Cout, Cin, KH, KW = weight_oihw.shape
    N = x_nhwc.shape[0]
    rows, Ho, Wo = _im2col(x_nhwc, KH, KW, stride, pad)
    # match im2col column order (kh, kw, cin):
    w_mat = jnp.transpose(weight_oihw, (2, 3, 1, 0)).reshape(KH * KW * Cin, Cout)
    out = _gemm_bias_act(rows, w_mat, bias, leaky, out_dtype)   # (N*Ho*Wo, Cout)
    return out.reshape(N, Ho, Wo, Cout)


# ----------------------------------------------------------------------------
# FlowModel forward
# ----------------------------------------------------------------------------
def init_params(key):
    """Deterministic Kaiming-ish init; PyTorch conv weight layout (Cout,Cin,KH,KW)."""
    cfg = [
        # name,         cin, cout, k, stride, pad, leaky
        ("conv1",         6,  16, 7, 2, 3, True),
        ("conv2",        16,  32, 5, 2, 2, True),
        ("conv3",        32,  64, 3, 2, 1, True),
        ("predict_flow", 64,   2, 3, 1, 1, False),
    ]
    params = []
    for i, (name, cin, cout, k, s, p, leaky) in enumerate(cfg):
        kw_key, kb_key = jax.random.split(jax.random.fold_in(key, i))
        fan_in = cin * k * k
        w = jax.random.normal(kw_key, (cout, cin, k, k), jnp.float32) * np.sqrt(2.0 / fan_in)
        b = jax.random.normal(kb_key, (cout,), jnp.float32) * 0.01
        params.append(dict(name=name, w=w, b=b, stride=s, pad=p, leaky=leaky))
    return params


def flow_model_forward(x_nchw, params):
    # NCHW -> NHWC, bf16 activations between layers (matmul inputs are bf16).
    x = jnp.transpose(x_nchw, (0, 2, 3, 1)).astype(jnp.bfloat16)
    n_layers = len(params)
    for idx, layer in enumerate(params):
        is_last = idx == n_layers - 1
        out_dtype = jnp.float32 if is_last else jnp.bfloat16
        x = conv2d_pallas(x, layer["w"], layer["b"],
                          layer["stride"], layer["pad"], layer["leaky"], out_dtype)
    # back to PyTorch NCHW convention for the returned feature.
    return jnp.transpose(x, (0, 3, 1, 2)).astype(jnp.float32)


# ----------------------------------------------------------------------------
# Reference (pure JAX/XLA) mirroring the bf16-matmul / f32-accumulate numerics
# ----------------------------------------------------------------------------
def flow_model_reference(x_nchw, params):
    x = x_nchw.astype(jnp.float32)
    n_layers = len(params)
    for idx, layer in enumerate(params):
        w, b, s, p = layer["w"], layer["b"], layer["stride"], layer["pad"]
        y = jax.lax.conv_general_dilated(
            x.astype(jnp.bfloat16), w.astype(jnp.bfloat16),
            window_strides=(s, s), padding=[(p, p), (p, p)],
            dimension_numbers=("NCHW", "OIHW", "NCHW"),
            preferred_element_type=jnp.float32)
        y = y + b.reshape(1, -1, 1, 1)
        if layer["leaky"]:
            y = jnp.where(y > 0, y, NEG_SLOPE * y)
        if idx != n_layers - 1:
            # mirror the kernel's bf16 inter-layer activation storage
            y = y.astype(jnp.bfloat16).astype(jnp.float32)
        x = y
    return x


if __name__ == "__main__":
    key = jax.random.PRNGKey(0)
    pkey, xkey = jax.random.split(key)

    params = init_params(pkey)

    # Input: stacked RGB image pair (6 channels), small spatial size.
    x = jax.random.normal(xkey, (2, 6, 16, 16), jnp.float32)

    out = jax.jit(lambda xx: flow_model_forward(xx, params))(x)
    out = jax.block_until_ready(out)

    ref = jax.block_until_ready(flow_model_reference(x, params))

    assert out.shape == ref.shape, (out.shape, ref.shape)
    assert bool(jnp.all(jnp.isfinite(out)))
    np.testing.assert_allclose(np.asarray(out), np.asarray(ref), rtol=2e-2, atol=2e-2)

    print("KERNEL_OK")
</pallas_src>

<mosaic_0001>
module attributes {stable_mosaic.version = 11 : i64} {
  func.func @_gemm_bias_act_kernel(%arg0: i32, %arg1: memref<128x384xbf16, #tpu.memory_space<vmem>>, %arg2: memref<384x128xbf16, #tpu.memory_space<vmem>>, %arg3: memref<1x128xf32, #tpu.memory_space<vmem>>, %arg4: memref<128x128xbf16, #tpu.memory_space<vmem>>) attributes {dimension_semantics = [#tpu.dimension_semantics<parallel>], iteration_bounds = array<i64: 1>, scalar_prefetch = 0 : i64, scratch_operands = 0 : i64, tpu.core_type = #tpu.core_type<tc>, window_params = [{transform_indices = @transform_0, window_bounds = array<i64: 128, 384>}, {pipeline_mode = #tpu.pipeline_mode<synchronous>, transform_indices = @transform_1, window_bounds = array<i64: 384, 128>}, {pipeline_mode = #tpu.pipeline_mode<synchronous>, transform_indices = @transform_2, window_bounds = array<i64: 1, 128>}, {transform_indices = @transform_3, window_bounds = array<i64: 128, 128>}]} {
    %c0 = arith.constant 0 : index
    %c0_0 = arith.constant 0 : index
    %0 = vector.load %arg1[%c0, %c0_0] : memref<128x384xbf16, #tpu.memory_space<vmem>>, vector<128x384xbf16>
    %c0_1 = arith.constant 0 : index
    %c0_2 = arith.constant 0 : index
    %1 = vector.load %arg2[%c0_1, %c0_2] : memref<384x128xbf16, #tpu.memory_space<vmem>>, vector<384x128xbf16>
    %cst = arith.constant dense<0.000000e+00> : vector<128x128xf32>
    %2 = tpu.matmul %0, %1, %cst {dimension_numbers = #tpu.dot_dimension_numbers<[1], [0], [0], [1], [0, 0, 1, 1], [], []>} : vector<128x384xbf16>, vector<384x128xbf16>, vector<128x128xf32> -> vector<128x128xf32>
    %c0_3 = arith.constant 0 : index
    %c0_4 = arith.constant 0 : index
    %3 = vector.load %arg3[%c0_3, %c0_4] : memref<1x128xf32, #tpu.memory_space<vmem>>, vector<1x128xf32>
    %4 = vector.broadcast %3 : vector<1x128xf32> to vector<128x128xf32>
    %5 = arith.addf %2, %4 : vector<128x128xf32>
    %cst_5 = arith.constant 0.000000e+00 : f32
    %6 = vector.broadcast %cst_5 : f32 to vector<128x128xf32>
    %7 = arith.cmpf ogt, %5, %6 : vector<128x128xf32>
    %cst_6 = arith.constant 1.000000e-01 : f32
    %8 = vector.broadcast %cst_6 : f32 to vector<128x128xf32>
    %9 = arith.mulf %8, %5 : vector<128x128xf32>
    %10 = arith.select %7, %5, %9 : vector<128x128xi1>, vector<128x128xf32>
    %11 = arith.truncf %10 : vector<128x128xf32> to vector<128x128xbf16>
    %c0_7 = arith.constant 0 : index
    %c0_8 = arith.constant 0 : index
    %12 = vector.load %arg4[%c0_7, %c0_8] : memref<128x128xbf16, #tpu.memory_space<vmem>>, vector<128x128xbf16>
    tpu.vector_store %arg4[%c0_7, %c0_8], %11 {strides = array<i32>} : memref<128x128xbf16, #tpu.memory_space<vmem>>, vector<128x128xbf16>,
    return
  }
  func.func @transform_0(%arg0: i32) -> (i32, i32) {
    %c0_i32 = arith.constant 0 : i32
    %c0_i32_0 = arith.constant 0 : i32
    return %arg0, %c0_i32 : i32, i32
  }
  func.func @transform_1(%arg0: i32) -> (i32, i32) {
    %c0_i32 = arith.constant 0 : i32
    %c0_i32_0 = arith.constant 0 : i32
    %c0_i32_1 = arith.constant 0 : i32
    return %c0_i32, %c0_i32_0 : i32, i32
  }
  func.func @transform_2(%arg0: i32) -> (i32, i32) {
    %c0_i32 = arith.constant 0 : i32
    %c0_i32_0 = arith.constant 0 : i32
    %c0_i32_1 = arith.constant 0 : i32
    return %c0_i32, %c0_i32_0 : i32, i32
  }
  func.func @transform_3(%arg0: i32) -> (i32, i32) {
    %c0_i32 = arith.constant 0 : i32
    %c0_i32_0 = arith.constant 0 : i32
    return %arg0, %c0_i32 : i32, i32
  }
}

module attributes {stable_mosaic.version = 11 : i64} {
  func.func @_gemm_bias_act_kernel(%arg0: i32, %arg1: memref<32x512xbf16, #tpu.memory_space<vmem>>, %arg2: memref<512x128xbf16, #tpu.memory_space<vmem>>, %arg3: memref<1x128xf32, #tpu.memory_space<vmem>>, %arg4: memref<32x128xbf16, #tpu.memory_space<vmem>>) attributes {dimension_semantics = [#tpu.dimension_semantics<parallel>], iteration_bounds = array<i64: 1>, scalar_prefetch = 0 : i64, scratch_operands = 0 : i64, tpu.core_type = #tpu.core_type<tc>, window_params = [{transform_indices = @transform_0, window_bounds = array<i64: 32, 512>}, {pipeline_mode = #tpu.pipeline_mode<synchronous>, transform_indices = @transform_1, window_bounds = array<i64: 512, 128>}, {pipeline_mode = #tpu.pipeline_mode<synchronous>, transform_indices = @transform_2, window_bounds = array<i64: 1, 128>}, {transform_indices = @transform_3, window_bounds = array<i64: 32, 128>}]} {
    %c0 = arith.constant 0 : index
    %c0_0 = arith.constant 0 : index
    %0 = vector.load %arg1[%c0, %c0_0] : memref<32x512xbf16, #tpu.memory_space<vmem>>, vector<32x512xbf16>
    %c0_1 = arith.constant 0 : index
    %c0_2 = arith.constant 0 : index
    %1 = vector.load %arg2[%c0_1, %c0_2] : memref<512x128xbf16, #tpu.memory_space<vmem>>, vector<512x128xbf16>
    %cst = arith.constant dense<0.000000e+00> : vector<32x128xf32>
    %2 = tpu.matmul %0, %1, %cst {dimension_numbers = #tpu.dot_dimension_numbers<[1], [0], [0], [1], [0, 0, 1, 1], [], []>} : vector<32x512xbf16>, vector<512x128xbf16>, vector<32x128xf32> -> vector<32x128xf32>
    %c0_3 = arith.constant 0 : index
    %c0_4 = arith.constant 0 : index
    %3 = vector.load %arg3[%c0_3, %c0_4] : memref<1x128xf32, #tpu.memory_space<vmem>>, vector<1x128xf32>
    %4 = vector.broadcast %3 : vector<1x128xf32> to vector<32x128xf32>
    %5 = arith.addf %2, %4 : vector<32x128xf32>
    %cst_5 = arith.constant 0.000000e+00 : f32
    %6 = vector.broadcast %cst_5 : f32 to vector<32x128xf32>
    %7 = arith.cmpf ogt, %5, %6 : vector<32x128xf32>
    %cst_6 = arith.constant 1.000000e-01 : f32
    %8 = vector.broadcast %cst_6 : f32 to vector<32x128xf32>
    %9 = arith.mulf %8, %5 : vector<32x128xf32>
    %10 = arith.select %7, %5, %9 : vector<32x128xi1>, vector<32x128xf32>
    %11 = arith.truncf %10 : vector<32x128xf32> to vector<32x128xbf16>
    %c0_7 = arith.constant 0 : index
    %c0_8 = arith.constant 0 : index
    %12 = vector.load %arg4[%c0_7, %c0_8] : memref<32x128xbf16, #tpu.memory_space<vmem>>, vector<32x128xbf16>
    tpu.vector_store %arg4[%c0_7, %c0_8], %11 {strides = array<i32>} : memref<32x128xbf16, #tpu.memory_space<vmem>>, vector<32x128xbf16>,
    return
  }
  func.func @transform_0(%arg0: i32) -> (i32, i32) {
    %c0_i32 = arith.constant 0 : i32
    %c0_i32_0 = arith.constant 0 : i32
    return %arg0, %c0_i32 : i32, i32
  }
  func.func @transform_1(%arg0: i32) -> (i32, i32) {
    %c0_i32 = arith.constant 0 : i32
    %c0_i32_0 = arith.constant 0 : i32
    %c0_i32_1 = arith.constant 0 : i32
    return %c0_i32, %c0_i32_0 : i32, i32
  }
  func.func @transform_2(%arg0: i32) -> (i32, i32) {
    %c0_i32 = arith.constant 0 : i32
    %c0_i32_0 = arith.constant 0 : i32
    %c0_i32_1 = arith.constant 0 : i32
    return %c0_i32, %c0_i32_0 : i32, i32
  }
  func.func @transform_3(%arg0: i32) -> (i32, i32) {
    %c0_i32 = arith.constant 0 : i32
    %c0_i32_0 = arith.constant 0 : i32
    return %arg0, %c0_i32 : i32, i32
  }
}

module attributes {stable_mosaic.version = 11 : i64} {
  func.func @_gemm_bias_act_kernel(%arg0: i32, %arg1: memref<8x384xbf16, #tpu.memory_space<vmem>>, %arg2: memref<384x128xbf16, #tpu.memory_space<vmem>>, %arg3: memref<1x128xf32, #tpu.memory_space<vmem>>, %arg4: memref<8x128xbf16, #tpu.memory_space<vmem>>) attributes {dimension_semantics = [#tpu.dimension_semantics<parallel>], iteration_bounds = array<i64: 1>, scalar_prefetch = 0 : i64, scratch_operands = 0 : i64, tpu.core_type = #tpu.core_type<tc>, window_params = [{transform_indices = @transform_0, window_bounds = array<i64: 8, 384>}, {pipeline_mode = #tpu.pipeline_mode<synchronous>, transform_indices = @transform_1, window_bounds = array<i64: 384, 128>}, {pipeline_mode = #tpu.pipeline_mode<synchronous>, transform_indices = @transform_2, window_bounds = array<i64: 1, 128>}, {transform_indices = @transform_3, window_bounds = array<i64: 8, 128>}]} {
    %c0 = arith.constant 0 : index
    %c0_0 = arith.constant 0 : index
    %0 = vector.load %arg1[%c0, %c0_0] : memref<8x384xbf16, #tpu.memory_space<vmem>>, vector<8x384xbf16>
    %c0_1 = arith.constant 0 : index
    %c0_2 = arith.constant 0 : index
    %1 = vector.load %arg2[%c0_1, %c0_2] : memref<384x128xbf16, #tpu.memory_space<vmem>>, vector<384x128xbf16>
    %cst = arith.constant dense<0.000000e+00> : vector<8x128xf32>
    %2 = tpu.matmul %0, %1, %cst {dimension_numbers = #tpu.dot_dimension_numbers<[1], [0], [0], [1], [0, 0, 1, 1], [], []>} : vector<8x384xbf16>, vector<384x128xbf16>, vector<8x128xf32> -> vector<8x128xf32>
    %c0_3 = arith.constant 0 : index
    %c0_4 = arith.constant 0 : index
    %3 = vector.load %arg3[%c0_3, %c0_4] : memref<1x128xf32, #tpu.memory_space<vmem>>, vector<1x128xf32>
    %4 = vector.broadcast %3 : vector<1x128xf32> to vector<8x128xf32>
    %5 = arith.addf %2, %4 : vector<8x128xf32>
    %cst_5 = arith.constant 0.000000e+00 : f32
    %6 = vector.broadcast %cst_5 : f32 to vector<8x128xf32>
    %7 = arith.cmpf ogt, %5, %6 : vector<8x128xf32>
    %cst_6 = arith.constant 1.000000e-01 : f32
    %8 = vector.broadcast %cst_6 : f32 to vector<8x128xf32>
    %9 = arith.mulf %8, %5 : vector<8x128xf32>
    %10 = arith.select %7, %5, %9 : vector<8x128xi1>, vector<8x128xf32>
    %11 = arith.truncf %10 : vector<8x128xf32> to vector<8x128xbf16>
    %c0_7 = arith.constant 0 : index
    %c0_8 = arith.constant 0 : index
    %12 = vector.load %arg4[%c0_7, %c0_8] : memref<8x128xbf16, #tpu.memory_space<vmem>>, vector<8x128xbf16>
    tpu.vector_store %arg4[%c0_7, %c0_8], %11 {strides = array<i32>} : memref<8x128xbf16, #tpu.memory_space<vmem>>, vector<8x128xbf16>,
    return
  }
  func.func @transform_0(%arg0: i32) -> (i32, i32) {
    %c0_i32 = arith.constant 0 : i32
    %c0_i32_0 = arith.constant 0 : i32
    return %arg0, %c0_i32 : i32, i32
  }
  func.func @transform_1(%arg0: i32) -> (i32, i32) {
    %c0_i32 = arith.constant 0 : i32
    %c0_i32_0 = arith.constant 0 : i32
    %c0_i32_1 = arith.constant 0 : i32
    return %c0_i32, %c0_i32_0 : i32, i32
  }
  func.func @transform_2(%arg0: i32) -> (i32, i32) {
    %c0_i32 = arith.constant 0 : i32
    %c0_i32_0 = arith.constant 0 : i32
    %c0_i32_1 = arith.constant 0 : i32
    return %c0_i32, %c0_i32_0 : i32, i32
  }
  func.func @transform_3(%arg0: i32) -> (i32, i32) {
    %c0_i32 = arith.constant 0 : i32
    %c0_i32_0 = arith.constant 0 : i32
    return %arg0, %c0_i32 : i32, i32
  }
}

module attributes {stable_mosaic.version = 11 : i64} {
  func.func @_gemm_bias_act_kernel(%arg0: i32, %arg1: memref<8x640xbf16, #tpu.memory_space<vmem>>, %arg2: memref<640x128xbf16, #tpu.memory_space<vmem>>, %arg3: memref<1x128xf32, #tpu.memory_space<vmem>>, %arg4: memref<8x128xf32, #tpu.memory_space<vmem>>) attributes {dimension_semantics = [#tpu.dimension_semantics<parallel>], iteration_bounds = array<i64: 1>, scalar_prefetch = 0 : i64, scratch_operands = 0 : i64, tpu.core_type = #tpu.core_type<tc>, window_params = [{transform_indices = @transform_0, window_bounds = array<i64: 8, 640>}, {pipeline_mode = #tpu.pipeline_mode<synchronous>, transform_indices = @transform_1, window_bounds = array<i64: 640, 128>}, {pipeline_mode = #tpu.pipeline_mode<synchronous>, transform_indices = @transform_2, window_bounds = array<i64: 1, 128>}, {transform_indices = @transform_3, window_bounds = array<i64: 8, 128>}]} {
    %c0 = arith.constant 0 : index
    %c0_0 = arith.constant 0 : index
    %0 = vector.load %arg1[%c0, %c0_0] : memref<8x640xbf16, #tpu.memory_space<vmem>>, vector<8x640xbf16>
    %c0_1 = arith.constant 0 : index
    %c0_2 = arith.constant 0 : index
    %1 = vector.load %arg2[%c0_1, %c0_2] : memref<640x128xbf16, #tpu.memory_space<vmem>>, vector<640x128xbf16>
    %cst = arith.constant dense<0.000000e+00> : vector<8x128xf32>
    %2 = tpu.matmul %0, %1, %cst {dimension_numbers = #tpu.dot_dimension_numbers<[1], [0], [0], [1], [0, 0, 1, 1], [], []>} : vector<8x640xbf16>, vector<640x128xbf16>, vector<8x128xf32> -> vector<8x128xf32>
    %c0_3 = arith.constant 0 : index
    %c0_4 = arith.constant 0 : index
    %3 = vector.load %arg3[%c0_3, %c0_4] : memref<1x128xf32, #tpu.memory_space<vmem>>, vector<1x128xf32>
    %4 = vector.broadcast %3 : vector<1x128xf32> to vector<8x128xf32>
    %5 = arith.addf %2, %4 : vector<8x128xf32>
    %c0_5 = arith.constant 0 : index
    %c0_6 = arith.constant 0 : index
    %6 = vector.load %arg4[%c0_5, %c0_6] : memref<8x128xf32, #tpu.memory_space<vmem>>, vector<8x128xf32>
    tpu.vector_store %arg4[%c0_5, %c0_6], %5 {strides = array<i32>} : memref<8x128xf32, #tpu.memory_space<vmem>>, vector<8x128xf32>,
    return
  }
  func.func @transform_0(%arg0: i32) -> (i32, i32) {
    %c0_i32 = arith.constant 0 : i32
    %c0_i32_0 = arith.constant 0 : i32
    return %arg0, %c0_i32 : i32, i32
  }
  func.func @transform_1(%arg0: i32) -> (i32, i32) {
    %c0_i32 = arith.constant 0 : i32
    %c0_i32_0 = arith.constant 0 : i32
    %c0_i32_1 = arith.constant 0 : i32
    return %c0_i32, %c0_i32_0 : i32, i32
  }
  func.func @transform_2(%arg0: i32) -> (i32, i32) {
    %c0_i32 = arith.constant 0 : i32
    %c0_i32_0 = arith.constant 0 : i32
    %c0_i32_1 = arith.constant 0 : i32
    return %c0_i32, %c0_i32_0 : i32, i32
  }
  func.func @transform_3(%arg0: i32) -> (i32, i32) {
    %c0_i32 = arith.constant 0 : i32
    %c0_i32_0 = arith.constant 0 : i32
    return %arg0, %c0_i32 : i32, i32
  }
}

</mosaic_0001>

<bundles_post_ra>
// kernel: _lambda_.4
= control target key start
LH: loop header
LB: loop body
LE: loop exit
PB: predicated region body
PF: predicated region fallthrough
CT: control target
= control target key end

     0   :  { %s1217_s1 = inlined_call_operand.vmem [shape: bf16[384,128], index: 1, kind: input, shape index: {}]   ;;  %s1218_s0 = inlined_call_operand.vmem [shape: bf16[128,384], index: 0, kind: input, shape index: {}]   ;;  %s1219_s2 = inlined_call_operand.vmem [shape: f32[1,128], index: 2, kind: input, shape index: {}]   ;;  %s1220_s3 = inlined_call_operand.vmem [shape: bf16[128,128], index: 3, kind: output, shape index: {}]  }
   0x1   :  { %v940_v0 = vld [vmem:[%s1217_s1 + $0x40] sm:$0xff]   ;;  %v942_v2 = vld [vmem:[%s1217_s1 + $0x48] sm:$0xff]   ;;  %v945_v5 = vld [vmem:[%s1217_s1 + $0x50] sm:$0xff]  }
   0x2   :  { %v941_v1 = vld [vmem:[%s1217_s1] sm:$0xff]   ;;  %828 = vmatprep.subr.bf16.mxu0 %v940_v0  ;;  %v944_v4 = vld [vmem:[%s1217_s1 + $0x8] sm:$0xff]   ;;  %v947_v7 = vld [vmem:[%s1217_s1 + $0x10] sm:$0xff]  }
   0x3   :  { %829 = vmatpush3.bf16.msra.mxu0 %v941_v1  ;;  %v943_v3 = vld [vmem:[%s1217_s1 + $0x80] sm:$0xff]   ;;  %v946_v6 = vld [vmem:[%s1217_s1 + $0x88] sm:$0xff]   ;;  %v948_v8 = vld [vmem:[%s1217_s1 + $0x58] sm:$0xff]  }
   0x4   :  { %830 = vmatprep.subr.bf16.mxu0 %v942_v2  ;;  %908 = vmatprep.subr.bf16.mxu1 %v943_v3  ;;  %v949_v9 = vld [vmem:[%s1217_s1 + $0x90] sm:$0xff]   ;;  %v950_v10 = vld [vmem:[%s1217_s1 + $0x18] sm:$0xff]   ;;  %v951_v11 = vld [vmem:[%s1217_s1 + $0x60] sm:$0xff]  }
   0x5   :  { %909 = vmatpush3.bf16.msra.mxu1 %v943_v3  ;;  %v952_v12 = vld [vmem:[%s1217_s1 + $0x98] sm:$0xff]   ;;  %v953_v13 = vld [vmem:[%s1217_s1 + $0x20] sm:$0xff]   ;;  %v954_v15 = vld [vmem:[%s1217_s1 + $0x68] sm:$0xff]  }
   0x6   :  { %910 = vmatprep.subr.bf16.mxu1 %v946_v6  ;;  %v955_v14 = vld [vmem:[%s1217_s1 + $0xa0] sm:$0xff]   ;;  %v956_v16 = vld [vmem:[%s1217_s1 + $0x28] sm:$0xff]   ;;  %v957_v18 = vld [vmem:[%s1217_s1 + $0x70] sm:$0xff]  }
   0x7   :  { %831 = vmatpush3.bf16.msra.mxu0 %v944_v4  ;;  %v958_v17 = vld [vmem:[%s1217_s1 + $0xa8] sm:$0xff]   ;;  %v959_v19 = vld [vmem:[%s1217_s1 + $0x30] sm:$0xff]   ;;  %v960_v20 = vld [vmem:[%s1217_s1 + $0x78] sm:$0xff]  }
   0x8   :  { %832 = vmatprep.subr.bf16.mxu0 %v945_v5  ;;  %v961_v21 = vld [vmem:[%s1217_s1 + $0xb0] sm:$0xff]   ;;  %v962_v23 = vld [vmem:[%s1217_s1 + $0x38] sm:$0xff]   ;;  %v963_v26 = vld [vmem:[%s1218_s0] ss:$12 sps:$4 sm:$0xff]  }
   0x9   :  { %911 = vmatpush3.bf16.msra.mxu1 %v946_v6  ;;  %v965_v22 = vld [vmem:[%s1218_s0 + $0x4] ss:$12 sps:$4 sm:$0xff]   ;;  %v967_v24 = vld [vmem:[%s1218_s0 + $0x8] ss:$12 sps:$4 sm:$0xff]   ;;  %v966_v25 = vld [vmem:[%s1217_s1 + $0xb8] sm:$0xff]  }
   0xa   :  { %912 = vmatprep.subr.bf16.mxu1 %v949_v9  ;;  %406 = vmatprep.mubr.bf16.mxu0 %v965_v22  ;;  %v969_v27 = vld [vmem:[%s1218_s0 + $0x1c] ss:$12 sps:$4 sm:$0xff]   ;;  %v968_v28 = vld [vmem:[%s1218_s0 + $0x20] ss:$12 sps:$4 sm:$0xff]   ;;  %v975_v29 = vld [vmem:[%s1218_s0 + $0x38] ss:$12 sps:$4 sm:$0xff]  }
   0xb   :  { %833 = vmatpush3.bf16.msra.mxu0 %v947_v7  ;;  %924 = vmatprep.mubr.bf16.mxu1 %v967_v24  ;;  %v971_v30 = vld [vmem:[%s1218_s0 + $0x18] ss:$12 sps:$4 sm:$0xff]   ;;  %v972_v31 = vld [vmem:[%s1218_s0 + $0x34] ss:$12 sps:$4 sm:$0xff]   ;;  %v976_v32 = vld [vmem:[%s1218_s0 + $0x50] ss:$12 sps:$4 sm:$0xff]  }
   0xc   :  { %834 = vmatprep.subr.bf16.mxu0 %v948_v8  ;;  %v983_v33 = vld [vmem:[%s1218_s0 + $0x68] ss:$12 sps:$4 sm:$0xff]   ;;  %v974_v34 = vld [vmem:[%s1218_s0 + $0x30] ss:$12 sps:$4 sm:$0xff]   ;;  %v977_v35 = vld [vmem:[%s1218_s0 + $0x4c] ss:$12 sps:$4 sm:$0xff]  }
   0xd   :  { %913 = vmatpush3.bf16.msra.mxu1 %v949_v9  ;;  %v984_v36 = vld [vmem:[%s1218_s0 + $0x80] ss:$12 sps:$4 sm:$0xff]   ;;  %v991_v37 = vld [vmem:[%s1218_s0 + $0x98] ss:$12 sps:$4 sm:$0xff]   ;;  %v979_v38 = vld [vmem:[%s1218_s0 + $0x48] ss:$12 sps:$4 sm:$0xff]  }
   0xe   :  { %914 = vmatprep.subr.bf16.mxu1 %v952_v12  ;;  %v980_v39 = vld [vmem:[%s1218_s0 + $0x64] ss:$12 sps:$4 sm:$0xff]   ;;  %v982_v41 = vld [vmem:[%s1218_s0 + $0x60] ss:$12 sps:$4 sm:$0xff]   ;;  %v985_v42 = vld [vmem:[%s1218_s0 + $0x7c] ss:$12 sps:$4 sm:$0xff]  }
   0xf   :  { %835 = vmatpush3.bf16.msra.mxu0 %v950_v10  ;;  %v992_v40 = vld [vmem:[%s1218_s0 + $0xb0] ss:$12 sps:$4 sm:$0xff]   ;;  %v987_v43 = vld [vmem:[%s1218_s0 + $0x78] ss:$12 sps:$4 sm:$0xff]   ;;  %v988_v44 = vld [vmem:[%s1218_s0 + $0x94] ss:$12 sps:$4 sm:$0xff]  }
  0x10   :  { %836 = vmatprep.subr.bf16.mxu0 %v951_v11  ;;  %v990_v45 = vld [vmem:[%s1218_s0 + $0x90] ss:$12 sps:$4 sm:$0xff]   ;;  %v993_v46 = vld [vmem:[%s1218_s0 + $0xac] ss:$12 sps:$4 sm:$0xff]   ;;  %v995_v47 = vld [vmem:[%s1218_s0 + $0xa8] ss:$12 sps:$4 sm:$0xff]  }
  0x11   :  { %915 = vmatpush3.bf16.msra.mxu1 %v952_v12  ;;  %v1163_v50 = vld [vmem:[%s1219_s2] ss:$0 sm:$0xff] }
  0x12   :  { %916 = vmatprep.subr.bf16.mxu1 %v955_v14 }
  0x13   :  { %837 = vmatpush3.bf16.msra.mxu0 %v953_v13 }
  0x14   :  { %838 = vmatprep.subr.bf16.mxu0 %v954_v15 }
  0x15   :  { %917 = vmatpush3.bf16.msra.mxu1 %v955_v14 }
  0x16   :  { %918 = vmatprep.subr.bf16.mxu1 %v958_v17 }
  0x17   :  { %839 = vmatpush3.bf16.msra.mxu0 %v956_v16 }
  0x18   :  { %840 = vmatprep.subr.bf16.mxu0 %v957_v18 }
  0x19   :  { %919 = vmatpush3.bf16.msra.mxu1 %v958_v17 }
  0x1a   :  { %920 = vmatprep.subr.bf16.mxu1 %v961_v21 }
  0x1b   :  { %841 = vmatpush3.bf16.msra.mxu0 %v959_v19 }
  0x1c   :  { %842 = vmatprep.subr.bf16.mxu0 %v960_v20 }
  0x1d   :  { %921 = vmatpush3.bf16.msra.mxu1 %v961_v21 }
  0x1e   :  { %922 = vmatprep.subr.bf16.mxu1 %v966_v25 }
  0x1f   :  { %843 = vmatpush3.bf16.msra.mxu0 %v962_v23 }
  0x21   :  { %923 = vmatpush3.bf16.msra.mxu1 %v966_v25 }
  0x22   :  { %407 = vmatmul.mubr.bf16.vlgmr.msra.gmra.mrb[0].mxu0 %v963_v26 }
  0x23   :  { %414 = vmatprep.mubr.bf16.mxu0 %v969_v27 }
  0x24   :  { %925 = vmatmul.mubr.bf16.vlgmr.msra.gmra.mrb[0].mxu1 %v968_v28 }
  0x25   :  { %928 = vmatprep.mubr.bf16.mxu1 %v975_v29 }
  0x2a   :  { %415 = vmatmul.mubr.bf16.gmra.mrb[4].mxu0 %v971_v30 }
  0x2b   :  { %422 = vmatprep.mubr.bf16.mxu0 %v972_v31 }
  0x2c   :  { %929 = vmatmul.mubr.bf16.gmra.mrb[4].mxu1 %v976_v32 }
  0x2d   :  { %932 = vmatprep.mubr.bf16.mxu1 %v983_v33 }
  0x32   :  { %423 = vmatmul.mubr.bf16.gmra.mrb[8].mxu0 %v974_v34 }
  0x33   :  { %430 = vmatprep.mubr.bf16.mxu0 %v977_v35 }
  0x34   :  { %933 = vmatmul.mubr.bf16.gmra.mrb[8].mxu1 %v984_v36 }
  0x35   :  { %936 = vmatprep.mubr.bf16.mxu1 %v991_v37 }
  0x3a   :  { %431 = vmatmul.mubr.bf16.gmra.mrb[12].mxu0 %v979_v38 }
  0x3b   :  { %438 = vmatprep.mubr.bf16.mxu0 %v980_v39 }
  0x3c   :  { %937 = vmatmul.mubr.bf16.gmra.mrb[12].mxu1 %v992_v40 }
  0x42   :  { %439 = vmatmul.mubr.bf16.gmra.mrb[16].mxu0 %v982_v41 }
  0x43   :  { %446 = vmatprep.mubr.bf16.mxu0 %v985_v42 }
  0x4a   :  { %447 = vmatmul.mubr.bf16.gmra.mrb[20].mxu0 %v987_v43 }
  0x4b   :  { %454 = vmatprep.mubr.bf16.mxu0 %v988_v44 }
  0x52   :  { %455 = vmatmul.mubr.bf16.gmra.mrb[24].mxu0 %v990_v45 }
  0x53   :  { %462 = vmatprep.mubr.bf16.mxu0 %v993_v46 }
  0x5a   :  { %463 = vmatmul.mubr.bf16.gmra.mrb[28].mxu0 %v995_v47 }
  0xf5   :  { %v844_v48 = vpop.f32.mrb[0].mxu0 }
  0xf6   :  { %v845_v49 = vpop.f32.mrb[1].mxu0 }
  0xf7   :  { %v846_v51 = vadd.f32 %v845_v49, %v844_v48  ;;  %v847_v52 = vpop.f32.mrb[2].mxu0  ;;  %v926_v54 = vpop.f32.mrb[0].mxu1 }
  0xf8   :  { %v848_v53 = vpop.f32.mrb[3].mxu0  ;;  %v505_v57 = vpop.f32.mrb[1].mxu1 }
  0xf9   :  { %v849_v55 = vadd.f32 %v848_v53, %v847_v52  ;;  %v409_v56 = vadd.f32 %v846_v51, %v1163_v50  ;;  %v927_v58 = vpop.f32.mrb[2].mxu1 }
  0xfa   :  { %v508_v61 = vpop.f32.mrb[3].mxu1 }
  0xfb   :  { %v506_v59 = vadd.f32 %v505_v57, %v409_v56  ;;  %v412_v60 = vadd.f32 %v849_v55, %v1163_v50 }
  0xfd   :  { %v584_v62 = vmul.f32 0.1, %v506_v59  ;;  %v509_v63 = vadd.f32 %v508_v61, %v412_v60  ;;  %v850_v0 = vpop.f32.mrb[4].mxu0  ;;  %vm568_vm0 = vcmp.gt.f32.partialorder %v506_v59, 0.0 }
  0xfe   :  { %v851_v1 = vpop.f32.mrb[5].mxu0 }
  0xff   :  { %vm569_vm1 = vcmp.gt.f32.partialorder %v509_v63, 0.0  ;;  %v585_v2 = vmul.f32 0.1, %v509_v63  ;;  %v852_v3 = vadd.f32 %v851_v1, %v850_v0  ;;  %v853_v4 = vpop.f32.mrb[6].mxu0  ;;  %v930_v6 = vpop.f32.mrb[4].mxu1  ;;  %v600_v7 = vsel %vm568_vm0, %v506_v59, %v584_v62 }
 0x100   :  { %v854_v5 = vpop.f32.mrb[7].mxu0  ;;  %v521_v11 = vpop.f32.mrb[5].mxu1 }
 0x101   :  { %v601_v8 = vsel %vm569_vm1, %v509_v63, %v585_v2  ;;  %v417_v9 = vadd.f32 %v852_v3, %v1163_v50  ;;  %v855_v10 = vadd.f32 %v854_v5, %v853_v4  ;;  %v931_v13 = vpop.f32.mrb[6].mxu1 }
 0x102   :  { %v784_v12 = vpack.c.bf16 %v601_v8, %v600_v7  ;;  %v524_v16 = vpop.f32.mrb[7].mxu1 }
 0x103   :  { %v514_v14 = vadd.f32 %v926_v54, %v417_v9  ;;  %v420_v15 = vadd.f32 %v855_v10, %v1163_v50 }
 0x104   :  { %785 = vst [vmem:[%s1220_s3] sm:$0xff] %v784_v12  }
 0x105   :  { %v586_v17 = vmul.f32 0.1, %v514_v14  ;;  %v517_v18 = vadd.f32 %v927_v58, %v420_v15  ;;  %v856_v19 = vpop.f32.mrb[8].mxu0  ;;  %vm570_vm2 = vcmp.gt.f32.partialorder %v514_v14, 0.0 }
 0x106   :  { %v857_v20 = vpop.f32.mrb[9].mxu0 }
 0x107   :  { %vm571_vm3 = vcmp.gt.f32.partialorder %v517_v18, 0.0  ;;  %v587_v21 = vmul.f32 0.1, %v517_v18  ;;  %v858_v22 = vadd.f32 %v857_v20, %v856_v19  ;;  %v859_v23 = vpop.f32.mrb[10].mxu0  ;;  %v1172_v25 = vpop.f32.mrb[8].mxu1  ;;  %v602_v26 = vsel %vm570_vm2, %v514_v14, %v586_v17 }
 0x108   :  { %v860_v24 = vpop.f32.mrb[11].mxu0  ;;  %v537_v30 = vpop.f32.mrb[9].mxu1 }
 0x109   :  { %v603_v27 = vsel %vm571_vm3, %v517_v18, %v587_v21  ;;  %v861_v28 = vadd.f32 %v860_v24, %v859_v23  ;;  %v425_v29 = vadd.f32 %v858_v22, %v1163_v50  ;;  %v1175_v32 = vpop.f32.mrb[10].mxu1 }
 0x10a   :  { %v789_v31 = vpack.c.bf16 %v603_v27, %v602_v26  ;;  %v540_v35 = vpop.f32.mrb[11].mxu1 }
 0x10b   :  { %v522_v33 = vadd.f32 %v521_v11, %v425_v29  ;;  %v428_v34 = vadd.f32 %v861_v28, %v1163_v50 }
 0x10c   :  { %821 = vst [vmem:[%s1220_s3 + $0x8] sm:$0xff] %v789_v31  }
 0x10d   :  { %v588_v36 = vmul.f32 0.1, %v522_v33  ;;  %v525_v37 = vadd.f32 %v524_v16, %v428_v34  ;;  %v862_v38 = vpop.f32.mrb[12].mxu0  ;;  %vm572_vm4 = vcmp.gt.f32.partialorder %v522_v33, 0.0 }
 0x10e   :  { %v863_v39 = vpop.f32.mrb[13].mxu0 }
 0x10f   :  { %vm573_vm5 = vcmp.gt.f32.partialorder %v525_v37, 0.0  ;;  %v589_v40 = vmul.f32 0.1, %v525_v37  ;;  %v864_v41 = vadd.f32 %v863_v39, %v862_v38  ;;  %v865_v42 = vpop.f32.mrb[14].mxu0  ;;  %v1181_v44 = vpop.f32.mrb[12].mxu1  ;;  %v604_v45 = vsel %vm572_vm4, %v522_v33, %v588_v36 }
 0x110   :  { %v866_v43 = vpop.f32.mrb[15].mxu0  ;;  %v553_v49 = vpop.f32.mrb[13].mxu1 }
 0x111   :  { %v605_v46 = vsel %vm573_vm5, %v525_v37, %v589_v40  ;;  %v433_v47 = vadd.f32 %v864_v41, %v1163_v50  ;;  %v867_v48 = vadd.f32 %v866_v43, %v865_v42  ;;  %v1184_v52 = vpop.f32.mrb[14].mxu1 }
 0x112   :  { %v794_v51 = vpack.c.bf16 %v605_v46, %v604_v45  ;;  %v556_v55 = vpop.f32.mrb[15].mxu1 }
 0x113   :  { %v530_v53 = vadd.f32 %v930_v6, %v433_v47  ;;  %v436_v54 = vadd.f32 %v867_v48, %v1163_v50 }
 0x114   :  { %822 = vst [vmem:[%s1220_s3 + $0x10] sm:$0xff] %v794_v51  }
 0x115   :  { %v590_v56 = vmul.f32 0.1, %v530_v53  ;;  %v533_v57 = vadd.f32 %v931_v13, %v436_v54  ;;  %v868_v58 = vpop.f32.mrb[16].mxu0  ;;  %vm574_vm6 = vcmp.gt.f32.partialorder %v530_v53, 0.0 }
 0x116   :  { %v869_v59 = vpop.f32.mrb[17].mxu0 }
 0x117   :  { %vm575_vm7 = vcmp.gt.f32.partialorder %v533_v57, 0.0  ;;  %v591_v60 = vmul.f32 0.1, %v533_v57  ;;  %v870_v61 = vadd.f32 %v869_v59, %v868_v58  ;;  %v871_v62 = vpop.f32.mrb[18].mxu0  ;;  %v606_v0 = vsel %vm574_vm6, %v530_v53, %v590_v56 }
 0x118   :  { %v872_v63 = vpop.f32.mrb[19].mxu0 }
 0x119   :  { %v607_v1 = vsel %vm575_vm7, %v533_v57, %v591_v60  ;;  %v873_v2 = vadd.f32 %v872_v63, %v871_v62  ;;  %v441_v3 = vadd.f32 %v870_v61, %v1163_v50 }
 0x11a   :  { %v799_v4 = vpack.c.bf16 %v607_v1, %v606_v0 }
 0x11b   :  { %v538_v5 = vadd.f32 %v537_v30, %v441_v3  ;;  %v444_v6 = vadd.f32 %v873_v2, %v1163_v50 }
 0x11c   :  { %823 = vst [vmem:[%s1220_s3 + $0x18] sm:$0xff] %v799_v4  }
 0x11d   :  { %v592_v7 = vmul.f32 0.1, %v538_v5  ;;  %v541_v8 = vadd.f32 %v540_v35, %v444_v6  ;;  %v874_v9 = vpop.f32.mrb[20].mxu0  ;;  %vm576_vm8 = vcmp.gt.f32.partialorder %v538_v5, 0.0 }
 0x11e   :  { %v875_v10 = vpop.f32.mrb[21].mxu0 }
 0x11f   :  { %vm577_vm9 = vcmp.gt.f32.partialorder %v541_v8, 0.0  ;;  %v593_v11 = vmul.f32 0.1, %v541_v8  ;;  %v876_v12 = vadd.f32 %v875_v10, %v874_v9  ;;  %v877_v13 = vpop.f32.mrb[22].mxu0  ;;  %v608_v15 = vsel %vm576_vm8, %v538_v5, %v592_v7 }
 0x120   :  { %v878_v14 = vpop.f32.mrb[23].mxu0 }
 0x121   :  { %v609_v16 = vsel %vm577_vm9, %v541_v8, %v593_v11  ;;  %v449_v17 = vadd.f32 %v876_v12, %v1163_v50  ;;  %v879_v18 = vadd.f32 %v878_v14, %v877_v13 }
 0x122   :  { %v804_v19 = vpack.c.bf16 %v609_v16, %v608_v15 }
 0x123   :  { %v546_v20 = vadd.f32 %v1172_v25, %v449_v17  ;;  %v452_v21 = vadd.f32 %v879_v18, %v1163_v50 }
 0x124   :  { %824 = vst [vmem:[%s1220_s3 + $0x20] sm:$0xff] %v804_v19  }
 0x125   :  { %v594_v22 = vmul.f32 0.1, %v546_v20  ;;  %v549_v23 = vadd.f32 %v1175_v32, %v452_v21  ;;  %v880_v24 = vpop.f32.mrb[24].mxu0  ;;  %vm578_vm10 = vcmp.gt.f32.partialorder %v546_v20, 0.0 }
 0x126   :  { %v881_v26 = vpop.f32.mrb[25].mxu0 }
 0x127   :  { %vm579_vm11 = vcmp.gt.f32.partialorder %v549_v23, 0.0  ;;  %v595_v27 = vmul.f32 0.1, %v549_v23  ;;  %v882_v28 = vadd.f32 %v881_v26, %v880_v24  ;;  %v883_v29 = vpop.f32.mrb[26].mxu0  ;;  %v610_v31 = vsel %vm578_vm10, %v546_v20, %v594_v22 }
 0x128   :  { %v884_v30 = vpop.f32.mrb[27].mxu0 }
 0x129   :  { %v611_v33 = vsel %vm579_vm11, %v549_v23, %v595_v27  ;;  %v885_v25 = vadd.f32 %v884_v30, %v883_v29  ;;  %v457_v34 = vadd.f32 %v882_v28, %v1163_v50 }
 0x12a   :  { %v809_v35 = vpack.c.bf16 %v611_v33, %v610_v31 }
 0x12b   :  { %v554_v36 = vadd.f32 %v553_v49, %v457_v34  ;;  %v460_v37 = vadd.f32 %v885_v25, %v1163_v50 }
 0x12c   :  { %825 = vst [vmem:[%s1220_s3 + $0x28] sm:$0xff] %v809_v35  }
 0x12d   :  { %v596_v32 = vmul.f32 0.1, %v554_v36  ;;  %v557_v38 = vadd.f32 %v556_v55, %v460_v37  ;;  %v886_v39 = vpop.f32.mrb[28].mxu0  ;;  %vm580_vm12 = vcmp.gt.f32.partialorder %v554_v36, 0.0 }
 0x12e   :  { %v887_v40 = vpop.f32.mrb[29].mxu0 }
 0x12f   :  { %vm581_vm13 = vcmp.gt.f32.partialorder %v557_v38, 0.0  ;;  %v597_v41 = vmul.f32 0.1, %v557_v38  ;;  %v888_v42 = vadd.f32 %v887_v40, %v886_v39  ;;  %v889_v43 = vpop.f32.mrb[30].mxu0  ;;  %v612_v46 = vsel %vm580_vm12, %v554_v36, %v596_v32 }
 0x130   :  { %v890_v45 = vpop.f32.mrb[31].mxu0 }
 0x131   :  { %v613_v47 = vsel %vm581_vm13, %v557_v38, %v597_v41  ;;  %v465_v48 = vadd.f32 %v888_v42, %v1163_v50  ;;  %v891_v49 = vadd.f32 %v890_v45, %v889_v43 }
 0x132   :  { %v814_v51 = vpack.c.bf16 %v613_v47, %v612_v46 }
 0x133   :  { %v562_v53 = vadd.f32 %v1181_v44, %v465_v48  ;;  %v468_v54 = vadd.f32 %v891_v49, %v1163_v50 }
 0x134   :  { %826 = vst [vmem:[%s1220_s3 + $0x30] sm:$0xff] %v814_v51  }
 0x135   :  { %v598_v55 = vmul.f32 0.1, %v562_v53  ;;  %v565_v56 = vadd.f32 %v1184_v52, %v468_v54  ;;  %vm582_vm14 = vcmp.gt.f32.partialorder %v562_v53, 0.0 }
 0x137   :  { %vm583_vm15 = vcmp.gt.f32.partialorder %v565_v56, 0.0  ;;  %v599_v57 = vmul.f32 0.1, %v565_v56  ;;  %v614_v58 = vsel %vm582_vm14, %v562_v53, %v598_v55 }
 0x139   :  { %v615_v59 = vsel %vm583_vm15, %v565_v56, %v599_v57 }
 0x13a   :  { %v819_v60 = vpack.c.bf16 %v615_v59, %v614_v58 }
 0x13c   :  { %827 = vst [vmem:[%s1220_s3 + $0x38] sm:$0xff] %v819_v60  }

// kernel: _lambda_.5
= control target key start
LH: loop header
LB: loop body
LE: loop exit
PB: predicated region body
PF: predicated region fallthrough
CT: control target
= control target key end

     0   :  { %s769_s1 = inlined_call_operand.vmem [shape: bf16[512,128], index: 1, kind: input, shape index: {}]   ;;  %s770_s0 = inlined_call_operand.vmem [shape: bf16[32,512], index: 0, kind: input, shape index: {}]   ;;  %s771_s2 = inlined_call_operand.vmem [shape: f32[1,128], index: 2, kind: input, shape index: {}]   ;;  %s772_s3 = inlined_call_operand.vmem [shape: bf16[32,128], index: 3, kind: output, shape index: {}]  }
   0x1   :  { %v576_v0 = vld [vmem:[%s769_s1 + $0x40] sm:$0xff]   ;;  %v580_v4 = vld [vmem:[%s769_s1 + $0x48] sm:$0xff]   ;;  %v584_v8 = vld [vmem:[%s769_s1 + $0x50] sm:$0xff]  }
   0x2   :  { %v577_v1 = vld [vmem:[%s769_s1 + $0xc0] sm:$0xff]   ;;  %520 = vmatprep.subr.bf16.mxu0 %v576_v0  ;;  %v581_v5 = vld [vmem:[%s769_s1 + $0xc8] sm:$0xff]   ;;  %v585_v9 = vld [vmem:[%s769_s1 + $0xd0] sm:$0xff]  }
   0x3   :  { %v578_v2 = vld [vmem:[%s769_s1] sm:$0xff]   ;;  %548 = vmatprep.subr.bf16.mxu1 %v577_v1  ;;  %v582_v6 = vld [vmem:[%s769_s1 + $0x8] sm:$0xff]   ;;  %v586_v10 = vld [vmem:[%s769_s1 + $0x10] sm:$0xff]  }
   0x4   :  { %v579_v3 = vld [vmem:[%s769_s1 + $0x80] sm:$0xff]   ;;  %521 = vmatpush3.bf16.msra.mxu0 %v578_v2  ;;  %v583_v7 = vld [vmem:[%s769_s1 + $0x88] sm:$0xff]   ;;  %v587_v11 = vld [vmem:[%s769_s1 + $0x90] sm:$0xff]  }
   0x5   :  { %549 = vmatpush3.bf16.msra.mxu1 %v579_v3  ;;  %522 = vmatprep.subr.bf16.mxu0 %v580_v4  ;;  %v588_v12 = vld [vmem:[%s769_s1 + $0x58] sm:$0xff]   ;;  %v592_v16 = vld [vmem:[%s769_s1 + $0x60] sm:$0xff]   ;;  %v596_v20 = vld [vmem:[%s769_s1 + $0x68] sm:$0xff]  }
   0x6   :  { %550 = vmatprep.subr.bf16.mxu1 %v581_v5  ;;  %v589_v13 = vld [vmem:[%s769_s1 + $0xd8] sm:$0xff]   ;;  %v593_v17 = vld [vmem:[%s769_s1 + $0xe0] sm:$0xff]   ;;  %v597_v21 = vld [vmem:[%s769_s1 + $0xe8] sm:$0xff]  }
   0x7   :  { %v590_v14 = vld [vmem:[%s769_s1 + $0x18] sm:$0xff]   ;;  %v594_v18 = vld [vmem:[%s769_s1 + $0x20] sm:$0xff]   ;;  %v598_v22 = vld [vmem:[%s769_s1 + $0x28] sm:$0xff]  }
   0x8   :  { %523 = vmatpush3.bf16.msra.mxu0 %v582_v6  ;;  %v591_v15 = vld [vmem:[%s769_s1 + $0x98] sm:$0xff]   ;;  %v595_v19 = vld [vmem:[%s769_s1 + $0xa0] sm:$0xff]   ;;  %v599_v23 = vld [vmem:[%s769_s1 + $0xa8] sm:$0xff]  }
   0x9   :  { %551 = vmatpush3.bf16.msra.mxu1 %v583_v7  ;;  %524 = vmatprep.subr.bf16.mxu0 %v584_v8  ;;  %v600_v24 = vld [vmem:[%s769_s1 + $0x70] sm:$0xff]   ;;  %v604_v28 = vld [vmem:[%s769_s1 + $0x78] sm:$0xff]   ;;  %v460_v42 = vld [vmem:[%s771_s2] ss:$0 sm:$0xff] }
   0xa   :  { %552 = vmatprep.subr.bf16.mxu1 %v585_v9  ;;  %v601_v25 = vld [vmem:[%s769_s1 + $0xf0] sm:$0xff]   ;;  %v605_v29 = vld [vmem:[%s769_s1 + $0xf8] sm:$0xff]  }
   0xb   :  { %v602_v26 = vld [vmem:[%s769_s1 + $0x30] sm:$0xff]   ;;  %v606_v30 = vld [vmem:[%s769_s1 + $0x38] sm:$0xff]  }
   0xc   :  { %525 = vmatpush3.bf16.msra.mxu0 %v586_v10  ;;  %v603_v27 = vld [vmem:[%s769_s1 + $0xb0] sm:$0xff]   ;;  %v607_v31 = vld [vmem:[%s769_s1 + $0xb8] sm:$0xff]  }
   0xd   :  { %553 = vmatpush3.bf16.msra.mxu1 %v587_v11  ;;  %526 = vmatprep.subr.bf16.mxu0 %v588_v12  ;;  %v608_v32 = vld [vmem:[%s770_s0] ss:$16 sps:$4 sm:$0xff]   ;;  %v610_v33 = vld [vmem:[%s770_s0 + $0x4] ss:$16 sps:$4 sm:$0xff]   ;;  %v611_v34 = vld [vmem:[%s770_s0 + $0x8] ss:$16 sps:$4 sm:$0xff]  }
   0xe   :  { %554 = vmatprep.subr.bf16.mxu1 %v589_v13  ;;  %v613_v35 = vld [vmem:[%s770_s0 + $0xc] ss:$16 sps:$4 sm:$0xff]   ;;  %358 = vmatprep.mubr.bf16.mxu0 %v610_v33  ;;  %v614_v36 = vld [vmem:[%s770_s0 + $0x24] ss:$16 sps:$4 sm:$0xff]   ;;  %v618_v38 = vld [vmem:[%s770_s0 + $0x20] ss:$16 sps:$4 sm:$0xff]  }
   0xf   :  { %407 = vmatprep.mubr.bf16.mxu1 %v613_v35  ;;  %v616_v37 = vld [vmem:[%s770_s0 + $0x2c] ss:$16 sps:$4 sm:$0xff]   ;;  %v619_v39 = vld [vmem:[%s770_s0 + $0x28] ss:$16 sps:$4 sm:$0xff]  }
  0x10   :  { %527 = vmatpush3.bf16.msra.mxu0 %v590_v14 }
  0x11   :  { %555 = vmatpush3.bf16.msra.mxu1 %v591_v15  ;;  %528 = vmatprep.subr.bf16.mxu0 %v592_v16 }
  0x12   :  { %556 = vmatprep.subr.bf16.mxu1 %v593_v17 }
  0x14   :  { %529 = vmatpush3.bf16.msra.mxu0 %v594_v18 }
  0x15   :  { %557 = vmatpush3.bf16.msra.mxu1 %v595_v19  ;;  %530 = vmatprep.subr.bf16.mxu0 %v596_v20 }
  0x16   :  { %558 = vmatprep.subr.bf16.mxu1 %v597_v21 }
  0x18   :  { %531 = vmatpush3.bf16.msra.mxu0 %v598_v22 }
  0x19   :  { %559 = vmatpush3.bf16.msra.mxu1 %v599_v23  ;;  %532 = vmatprep.subr.bf16.mxu0 %v600_v24 }
  0x1a   :  { %560 = vmatprep.subr.bf16.mxu1 %v601_v25 }
  0x1c   :  { %533 = vmatpush3.bf16.msra.mxu0 %v602_v26 }
  0x1d   :  { %561 = vmatpush3.bf16.msra.mxu1 %v603_v27  ;;  %534 = vmatprep.subr.bf16.mxu0 %v604_v28 }
  0x1e   :  { %562 = vmatprep.subr.bf16.mxu1 %v605_v29 }
  0x20   :  { %535 = vmatpush3.bf16.msra.mxu0 %v606_v30 }
  0x21   :  { %563 = vmatpush3.bf16.msra.mxu1 %v607_v31 }
  0x23   :  { %359 = vmatmul.mubr.bf16.vlgmr.msra.gmra.mrb[0].mxu0 %v608_v32 }
  0x24   :  { %408 = vmatmul.mubr.bf16.vlgmr.msra.gmra.mrb[0].mxu1 %v611_v34  ;;  %366 = vmatprep.mubr.bf16.mxu0 %v614_v36 }
  0x25   :  { %415 = vmatprep.mubr.bf16.mxu1 %v616_v37 }
  0x2b   :  { %367 = vmatmul.mubr.bf16.gmra.mrb[4].mxu0 %v618_v38 }
  0x2c   :  { %416 = vmatmul.mubr.bf16.gmra.mrb[4].mxu1 %v619_v39 }
  0xf6   :  { %v536_v40 = vpop.f32.mrb[0].mxu0 }
  0xf7   :  { %v564_v41 = vpop.f32.mrb[0].mxu1  ;;  %v537_v43 = vpop.f32.mrb[1].mxu0 }
  0xf8   :  { %v538_v44 = vadd.f32 %v537_v43, %v536_v40  ;;  %v565_v45 = vpop.f32.mrb[1].mxu1  ;;  %v539_v46 = vpop.f32.mrb[2].mxu0 }
  0xf9   :  { %v566_v47 = vadd.f32 %v565_v45, %v564_v41  ;;  %v567_v48 = vpop.f32.mrb[2].mxu1  ;;  %v540_v49 = vpop.f32.mrb[3].mxu0 }
  0xfa   :  { %v361_v50 = vadd.f32 %v538_v44, %v460_v42  ;;  %v541_v51 = vadd.f32 %v540_v49, %v539_v46  ;;  %v568_v52 = vpop.f32.mrb[3].mxu1 }
  0xfb   :  { %v569_v53 = vadd.f32 %v568_v52, %v567_v48 }
  0xfc   :  { %v410_v54 = vadd.f32 %v566_v47, %v361_v50  ;;  %v364_v55 = vadd.f32 %v541_v51, %v460_v42 }
  0xfe   :  { %v428_v56 = vmul.f32 0.1, %v410_v54  ;;  %v413_v57 = vadd.f32 %v569_v53, %v364_v55  ;;  %v542_v58 = vpop.f32.mrb[4].mxu0  ;;  %vm424_vm0 = vcmp.gt.f32.partialorder %v410_v54, 0.0 }
  0xff   :  { %v570_v59 = vpop.f32.mrb[4].mxu1  ;;  %v543_v60 = vpop.f32.mrb[5].mxu0 }
 0x100   :  { %vm425_vm1 = vcmp.gt.f32.partialorder %v413_v57, 0.0  ;;  %v429_v61 = vmul.f32 0.1, %v413_v57  ;;  %v544_v62 = vadd.f32 %v543_v60, %v542_v58  ;;  %v571_v63 = vpop.f32.mrb[5].mxu1  ;;  %v545_v0 = vpop.f32.mrb[6].mxu0  ;;  %v432_v4 = vsel %vm424_vm0, %v410_v54, %v428_v56 }
 0x101   :  { %v572_v1 = vadd.f32 %v571_v63, %v570_v59  ;;  %v573_v2 = vpop.f32.mrb[6].mxu1  ;;  %v546_v3 = vpop.f32.mrb[7].mxu0 }
 0x102   :  { %v433_v5 = vsel %vm425_vm1, %v413_v57, %v429_v61  ;;  %v369_v6 = vadd.f32 %v544_v62, %v460_v42  ;;  %v547_v7 = vadd.f32 %v546_v3, %v545_v0  ;;  %v574_v8 = vpop.f32.mrb[7].mxu1 }
 0x103   :  { %v512_v9 = vpack.c.bf16 %v433_v5, %v432_v4  ;;  %v575_v10 = vadd.f32 %v574_v8, %v573_v2 }
 0x104   :  { %v418_v11 = vadd.f32 %v572_v1, %v369_v6  ;;  %v372_v12 = vadd.f32 %v547_v7, %v460_v42 }
 0x105   :  { %513 = vst [vmem:[%s772_s3] sm:$0xff] %v512_v9  }
 0x106   :  { %v430_v13 = vmul.f32 0.1, %v418_v11  ;;  %v421_v14 = vadd.f32 %v575_v10, %v372_v12  ;;  %vm426_vm2 = vcmp.gt.f32.partialorder %v418_v11, 0.0 }
 0x108   :  { %vm427_vm3 = vcmp.gt.f32.partialorder %v421_v14, 0.0  ;;  %v431_v15 = vmul.f32 0.1, %v421_v14  ;;  %v434_v16 = vsel %vm426_vm2, %v418_v11, %v430_v13 }
 0x10a   :  { %v435_v17 = vsel %vm427_vm3, %v421_v14, %v431_v15 }
 0x10b   :  { %v517_v18 = vpack.c.bf16 %v435_v17, %v434_v16 }
 0x10d   :  { %519 = vst [vmem:[%s772_s3 + $0x8] sm:$0xff] %v517_v18  }

// kernel: _lambda_.6
= control target key start
LH: loop header
LB: loop body
LE: loop exit
PB: predicated region body
PF: predicated region fallthrough
CT: control target
= control target key end

     0   :  { %v424_v1 = vmov 0.0   ;;  %vm425_vm0 = vmmov 0   ;;  %s530_s1 = inlined_call_operand.vmem [shape: bf16[384,128], index: 1, kind: input, shape index: {}]   ;;  %s531_s0 = inlined_call_operand.vmem [shape: bf16[8,384], index: 0, kind: input, shape index: {}]   ;;  %s532_s2 = inlined_call_operand.vmem [shape: f32[1,128], index: 2, kind: input, shape index: {}]   ;;  %s533_s3 = inlined_call_operand.vmem [shape: bf16[8,128], index: 3, kind: output, shape index: {}]  }
   0x1   :  { %v397_v0 = vld [vmem:[%s530_s1 + $0x40] sm:$0xff]   ;;  %375 = vmatprep.subr.bf16.mxu1 %v424_v1  ;;  %391 = vmatprep.mubr.msk.bf16.mxu1 %vm425_vm0, %v424_v1  ;;  %v400_v4 = vld [vmem:[%s530_s1 + $0x48] sm:$0xff]   ;;  %v403_v7 = vld [vmem:[%s530_s1 + $0x50] sm:$0xff]  }
   0x2   :  { %v398_v2 = vld [vmem:[%s530_s1] sm:$0xff]   ;;  %344 = vmatprep.subr.bf16.mxu0 %v397_v0  ;;  %v401_v5 = vld [vmem:[%s530_s1 + $0x8] sm:$0xff]   ;;  %v404_v8 = vld [vmem:[%s530_s1 + $0x10] sm:$0xff]  }
   0x3   :  { %v399_v3 = vld [vmem:[%s530_s1 + $0x80] sm:$0xff]   ;;  %345 = vmatpush3.bf16.msra.mxu0 %v398_v2  ;;  %v402_v6 = vld [vmem:[%s530_s1 + $0x88] sm:$0xff]   ;;  %v405_v9 = vld [vmem:[%s530_s1 + $0x90] sm:$0xff]  }
   0x4   :  { %376 = vmatpush3.bf16.msra.mxu1 %v399_v3  ;;  %346 = vmatprep.subr.bf16.mxu0 %v400_v4  ;;  %v406_v10 = vld [vmem:[%s530_s1 + $0x58] sm:$0xff]   ;;  %v409_v13 = vld [vmem:[%s530_s1 + $0x60] sm:$0xff]   ;;  %v412_v16 = vld [vmem:[%s530_s1 + $0x68] sm:$0xff]  }
   0x5   :  { %377 = vmatprep.subr.bf16.mxu1 %v424_v1  ;;  %v407_v11 = vld [vmem:[%s530_s1 + $0x18] sm:$0xff]   ;;  %v410_v14 = vld [vmem:[%s530_s1 + $0x20] sm:$0xff]   ;;  %v413_v17 = vld [vmem:[%s530_s1 + $0x28] sm:$0xff]  }
   0x6   :  { %v408_v12 = vld [vmem:[%s530_s1 + $0x98] sm:$0xff]   ;;  %v411_v15 = vld [vmem:[%s530_s1 + $0xa0] sm:$0xff]   ;;  %v414_v18 = vld [vmem:[%s530_s1 + $0xa8] sm:$0xff]  }
   0x7   :  { %347 = vmatpush3.bf16.msra.mxu0 %v401_v5  ;;  %v415_v19 = vld [vmem:[%s530_s1 + $0x70] sm:$0xff]   ;;  %v15_v22 = vld [vmem:[%s531_s0] sm:$0xff]  ;;  %v418_v23 = vld [vmem:[%s530_s1 + $0x78] sm:$0xff]  }
   0x8   :  { %378 = vmatpush3.bf16.msra.mxu1 %v402_v6  ;;  %348 = vmatprep.subr.bf16.mxu0 %v403_v7  ;;  %v416_v20 = vld [vmem:[%s530_s1 + $0x30] sm:$0xff]   ;;  %v318_v24 = vcombine.high %v15_v22, %v15_v22  ;;  %v419_v25 = vld [vmem:[%s530_s1 + $0x38] sm:$0xff]   ;;  %v317_v27 = vcombine.low %v15_v22, %v15_v22  ;;  %v422_v28 = vld [vmem:[%s531_s0 + $0x8] ss:$0 sps:$4 sm:$0xff]  }
   0x9   :  { %379 = vmatprep.subr.bf16.mxu1 %v424_v1  ;;  %v417_v21 = vld [vmem:[%s530_s1 + $0xb0] sm:$0xff]   ;;  %v423_v26 = vld [vmem:[%s530_s1 + $0xb8] sm:$0xff]   ;;  %v316_v31 = vld [vmem:[%s532_s2] ss:$0 sm:$0xff] }
   0xa   :  { %259 = vmatprep.mubr.bf16.mxu0 %v318_v24 }
   0xb   :  { %349 = vmatpush3.bf16.msra.mxu0 %v404_v8 }
   0xc   :  { %380 = vmatpush3.bf16.msra.mxu1 %v405_v9  ;;  %350 = vmatprep.subr.bf16.mxu0 %v406_v10 }
   0xd   :  { %381 = vmatprep.subr.bf16.mxu1 %v424_v1 }
   0xf   :  { %351 = vmatpush3.bf16.msra.mxu0 %v407_v11 }
  0x10   :  { %382 = vmatpush3.bf16.msra.mxu1 %v408_v12  ;;  %352 = vmatprep.subr.bf16.mxu0 %v409_v13 }
  0x11   :  { %383 = vmatprep.subr.bf16.mxu1 %v424_v1 }
  0x13   :  { %353 = vmatpush3.bf16.msra.mxu0 %v410_v14 }
  0x14   :  { %384 = vmatpush3.bf16.msra.mxu1 %v411_v15  ;;  %354 = vmatprep.subr.bf16.mxu0 %v412_v16 }
  0x15   :  { %385 = vmatprep.subr.bf16.mxu1 %v424_v1 }
  0x17   :  { %355 = vmatpush3.bf16.msra.mxu0 %v413_v17 }
  0x18   :  { %386 = vmatpush3.bf16.msra.mxu1 %v414_v18  ;;  %356 = vmatprep.subr.bf16.mxu0 %v415_v19 }
  0x19   :  { %387 = vmatprep.subr.bf16.mxu1 %v424_v1 }
  0x1b   :  { %357 = vmatpush3.bf16.msra.mxu0 %v416_v20 }
  0x1c   :  { %388 = vmatpush3.bf16.msra.mxu1 %v417_v21  ;;  %358 = vmatprep.subr.bf16.mxu0 %v418_v23 }
  0x1d   :  { %389 = vmatprep.subr.bf16.mxu1 %v424_v1 }
  0x1f   :  { %359 = vmatpush3.bf16.msra.mxu0 %v419_v25 }
  0x20   :  { %390 = vmatpush3.bf16.msra.mxu1 %v423_v26 }
  0x22   :  { %260 = vmatmul.mubr.bf16.vlgmr.msra.gmra.mrb[0].mxu0 %v317_v27 }
  0x23   :  { %392 = vmatmul.mubr.bf16.vlgmr.msra.gmra.mrb[0].mxu1 %v422_v28 }
  0xf5   :  { %v360_v29 = vpop.f32.mrb[0].mxu0 }
  0xf6   :  { %v361_v30 = vpop.f32.mrb[1].mxu0  ;;  %v301_v32 = vpop.f32.mrb[0].mxu1 }
  0xf7   :  { %v362_v33 = vadd.f32 %v361_v30, %v360_v29  ;;  %v363_v34 = vpop.f32.mrb[2].mxu0  ;;  %v393_v35 = vpop.f32.mrb[1].mxu1 }
  0xf8   :  { %v364_v36 = vpop.f32.mrb[3].mxu0  ;;  %v304_v37 = vpop.f32.mrb[2].mxu1 }
  0xf9   :  { %v262_v38 = vadd.f32 %v362_v33, %v316_v31  ;;  %v394_v39 = vpop.f32.mrb[3].mxu1 }
  0xfb   :  { %v302_v40 = vadd.f32 %v301_v32, %v262_v38 }
  0xfd   :  { %vm307_vm1 = vcmp.gt.f32.partialorder %v302_v40, 0.0  ;;  %v308_v41 = vmul.f32 0.1, %v302_v40 }
  0xff   :  { %v309_v42 = vsel %vm307_vm1, %v302_v40, %v308_v41 }
 0x100   :  { %v310_v43 = vpack.c.bf16 %v309_v42, %v309_v42 }
 0x102   :  { %311 = vst [vmem:[%s533_s3] sm:$0xf] %v310_v43 }

// kernel: _lambda_.7
= control target key start
LH: loop header
LB: loop body
LE: loop exit
PB: predicated region body
PF: predicated region fallthrough
CT: control target
= control target key end

     0   :  { %v654_v35 = vmov 0.0   ;;  %vm655_vm0 = vmmov 0   ;;  %s811_s1 = inlined_call_operand.vmem [shape: bf16[640,128], index: 1, kind: input, shape index: {}]   ;;  %s812_s0 = inlined_call_operand.vmem [shape: bf16[8,640], index: 0, kind: input, shape index: {}]   ;;  %s813_s2 = inlined_call_operand.vmem [shape: f32[1,128], index: 2, kind: input, shape index: {}]   ;;  %s814_s3 = inlined_call_operand.vmem [shape: f32[8,128], index: 3, kind: output, shape index: {}]  }
   0x1   :  { %v609_v0 = vld [vmem:[%s811_s1 + $0x40] sm:$0xff]   ;;  %v613_v4 = vld [vmem:[%s811_s1 + $0x48] sm:$0xff]   ;;  %v617_v8 = vld [vmem:[%s811_s1 + $0x50] sm:$0xff]  }
   0x2   :  { %v610_v1 = vld [vmem:[%s811_s1] sm:$0xff]   ;;  %534 = vmatprep.subr.bf16.mxu0 %v609_v0  ;;  %v614_v5 = vld [vmem:[%s811_s1 + $0x8] sm:$0xff]   ;;  %v618_v9 = vld [vmem:[%s811_s1 + $0x10] sm:$0xff]  }
   0x3   :  { %v611_v2 = vld [vmem:[%s811_s1 + $0xc0] sm:$0xff]   ;;  %535 = vmatpush3.bf16.msra.mxu0 %v610_v1  ;;  %v615_v6 = vld [vmem:[%s811_s1 + $0xc8] sm:$0xff]   ;;  %v619_v10 = vld [vmem:[%s811_s1 + $0xd0] sm:$0xff]  }
   0x4   :  { %v612_v3 = vld [vmem:[%s811_s1 + $0x80] sm:$0xff]   ;;  %556 = vmatprep.subr.bf16.mxu1 %v611_v2  ;;  %536 = vmatprep.subr.bf16.mxu0 %v613_v4  ;;  %v616_v7 = vld [vmem:[%s811_s1 + $0x88] sm:$0xff]   ;;  %v620_v11 = vld [vmem:[%s811_s1 + $0x90] sm:$0xff]  }
   0x5   :  { %557 = vmatpush3.bf16.msra.mxu1 %v612_v3  ;;  %v621_v12 = vld [vmem:[%s811_s1 + $0x58] sm:$0xff]   ;;  %v625_v16 = vld [vmem:[%s811_s1 + $0x60] sm:$0xff]   ;;  %v629_v20 = vld [vmem:[%s811_s1 + $0x68] sm:$0xff]  }
   0x6   :  { %558 = vmatprep.subr.bf16.mxu1 %v615_v6  ;;  %v622_v13 = vld [vmem:[%s811_s1 + $0x18] sm:$0xff]   ;;  %v626_v17 = vld [vmem:[%s811_s1 + $0x20] sm:$0xff]   ;;  %v630_v21 = vld [vmem:[%s811_s1 + $0x28] sm:$0xff]  }
   0x7   :  { %537 = vmatpush3.bf16.msra.mxu0 %v614_v5  ;;  %v623_v14 = vld [vmem:[%s811_s1 + $0xd8] sm:$0xff]   ;;  %v627_v18 = vld [vmem:[%s811_s1 + $0xe0] sm:$0xff]   ;;  %v631_v22 = vld [vmem:[%s811_s1 + $0xe8] sm:$0xff]  }
   0x8   :  { %538 = vmatprep.subr.bf16.mxu0 %v617_v8  ;;  %v624_v15 = vld [vmem:[%s811_s1 + $0x98] sm:$0xff]   ;;  %v628_v19 = vld [vmem:[%s811_s1 + $0xa0] sm:$0xff]   ;;  %v632_v23 = vld [vmem:[%s811_s1 + $0xa8] sm:$0xff]  }
   0x9   :  { %559 = vmatpush3.bf16.msra.mxu1 %v616_v7  ;;  %v633_v24 = vld [vmem:[%s811_s1 + $0x70] sm:$0xff]   ;;  %v637_v28 = vld [vmem:[%s811_s1 + $0x78] sm:$0xff]   ;;  %v15_v31 = vld [vmem:[%s812_s0] sm:$0xff] }
   0xa   :  { %560 = vmatprep.subr.bf16.mxu1 %v619_v10  ;;  %v634_v25 = vld [vmem:[%s811_s1 + $0x30] sm:$0xff]   ;;  %v638_v29 = vld [vmem:[%s811_s1 + $0x38] sm:$0xff]   ;;  %v489_v32 = vcombine.low %v15_v31, %v15_v31  ;;  %v490_v33 = vcombine.high %v15_v31, %v15_v31  ;;  %v16_v36 = vld [vmem:[%s812_s0 + $0x8] sm:$0xff] }
   0xb   :  { %539 = vmatpush3.bf16.msra.mxu0 %v618_v9  ;;  %v635_v26 = vld [vmem:[%s811_s1 + $0xf0] sm:$0xff]   ;;  %v639_v30 = vld [vmem:[%s811_s1 + $0xf8] sm:$0xff]   ;;  %v491_v37 = vcombine.low %v16_v36, %v16_v36  ;;  %v492_v38 = vcombine.high %v16_v36, %v16_v36  ;;  %v646_v39 = vld [vmem:[%s811_s1 + $0x100] sm:$0xff]  }
   0xc   :  { %540 = vmatprep.subr.bf16.mxu0 %v621_v12  ;;  %v636_v27 = vld [vmem:[%s811_s1 + $0xb0] sm:$0xff]   ;;  %v643_v34 = vld [vmem:[%s811_s1 + $0xb8] sm:$0xff]   ;;  %395 = vmatprep.mubr.bf16.mxu0 %v490_v33  ;;  %v647_v40 = vld [vmem:[%s811_s1 + $0x108] sm:$0xff]  }
   0xd   :  { %561 = vmatpush3.bf16.msra.mxu1 %v620_v11  ;;  %435 = vmatprep.mubr.bf16.mxu1 %v492_v38  ;;  %v648_v41 = vld [vmem:[%s811_s1 + $0x110] sm:$0xff]   ;;  %v649_v42 = vld [vmem:[%s811_s1 + $0x118] sm:$0xff]   ;;  %v650_v43 = vld [vmem:[%s811_s1 + $0x120] sm:$0xff]  }
   0xe   :  { %562 = vmatprep.subr.bf16.mxu1 %v623_v14  ;;  %v651_v44 = vld [vmem:[%s811_s1 + $0x128] sm:$0xff]   ;;  %v652_v45 = vld [vmem:[%s811_s1 + $0x130] sm:$0xff]   ;;  %v653_v46 = vld [vmem:[%s811_s1 + $0x138] sm:$0xff]  }
   0xf   :  { %541 = vmatpush3.bf16.msra.mxu0 %v622_v13  ;;  %v642_v47 = vld [vmem:[%s812_s0 + $0x10] ss:$0 sps:$4 sm:$0xff]   ;;  %v488_v49 = vld [vmem:[%s813_s2] ss:$0 sm:$0xff] }
  0x10   :  { %542 = vmatprep.subr.bf16.mxu0 %v625_v16 }
  0x11   :  { %563 = vmatpush3.bf16.msra.mxu1 %v624_v15 }
  0x12   :  { %564 = vmatprep.subr.bf16.mxu1 %v627_v18 }
  0x13   :  { %543 = vmatpush3.bf16.msra.mxu0 %v626_v17 }
  0x14   :  { %544 = vmatprep.subr.bf16.mxu0 %v629_v20 }
  0x15   :  { %565 = vmatpush3.bf16.msra.mxu1 %v628_v19 }
  0x16   :  { %566 = vmatprep.subr.bf16.mxu1 %v631_v22 }
  0x17   :  { %545 = vmatpush3.bf16.msra.mxu0 %v630_v21 }
  0x18   :  { %546 = vmatprep.subr.bf16.mxu0 %v633_v24 }
  0x19   :  { %567 = vmatpush3.bf16.msra.mxu1 %v632_v23 }
  0x1a   :  { %568 = vmatprep.subr.bf16.mxu1 %v635_v26 }
  0x1b   :  { %547 = vmatpush3.bf16.msra.mxu0 %v634_v25 }
  0x1c   :  { %548 = vmatprep.subr.bf16.mxu0 %v637_v28 }
  0x1d   :  { %569 = vmatpush3.bf16.msra.mxu1 %v636_v27 }
  0x1e   :  { %570 = vmatprep.subr.bf16.mxu1 %v639_v30 }
  0x1f   :  { %549 = vmatpush3.bf16.msra.mxu0 %v638_v29 }
  0x20   :  { %587 = vmatprep.subr.bf16.mxu0 %v654_v35 }
  0x21   :  { %571 = vmatpush3.bf16.msra.mxu1 %v643_v34 }
  0x22   :  { %396 = vmatmul.mubr.bf16.vlgmr.msra.gmra.mrb[0].mxu0 %v489_v32 }
  0x23   :  { %588 = vmatpush3.bf16.msra.mxu0 %v646_v39  ;;  %603 = vmatprep.mubr.msk.bf16.mxu0 %vm655_vm0, %v654_v35 }
  0x24   :  { %436 = vmatmul.mubr.bf16.vlgmr.msra.gmra.mrb[0].mxu1 %v491_v37  ;;  %589 = vmatprep.subr.bf16.mxu0 %v654_v35 }
  0x27   :  { %590 = vmatpush3.bf16.msra.mxu0 %v647_v40 }
  0x28   :  { %591 = vmatprep.subr.bf16.mxu0 %v654_v35 }
  0x2b   :  { %592 = vmatpush3.bf16.msra.mxu0 %v648_v41 }
  0x2c   :  { %593 = vmatprep.subr.bf16.mxu0 %v654_v35 }
  0x2f   :  { %594 = vmatpush3.bf16.msra.mxu0 %v649_v42 }
  0x30   :  { %595 = vmatprep.subr.bf16.mxu0 %v654_v35 }
  0x33   :  { %596 = vmatpush3.bf16.msra.mxu0 %v650_v43 }
  0x34   :  { %597 = vmatprep.subr.bf16.mxu0 %v654_v35 }
  0x37   :  { %598 = vmatpush3.bf16.msra.mxu0 %v651_v44 }
  0x38   :  { %599 = vmatprep.subr.bf16.mxu0 %v654_v35 }
  0x3b   :  { %600 = vmatpush3.bf16.msra.mxu0 %v652_v45 }
  0x3c   :  { %601 = vmatprep.subr.bf16.mxu0 %v654_v35 }
  0x3f   :  { %602 = vmatpush3.bf16.msra.mxu0 %v653_v46 }
  0x42   :  { %604 = vmatmul.mubr.bf16.vlgmr.msra.gmra.mrb[4].mxu0 %v642_v47 }
  0xf5   :  { %v550_v48 = vpop.f32.mrb[0].mxu0 }
  0xf6   :  { %v551_v50 = vpop.f32.mrb[1].mxu0 }
  0xf7   :  { %v552_v51 = vadd.f32 %v551_v50, %v550_v48  ;;  %v553_v52 = vpop.f32.mrb[2].mxu0  ;;  %v572_v53 = vpop.f32.mrb[0].mxu1 }
  0xf8   :  { %v554_v54 = vpop.f32.mrb[3].mxu0  ;;  %v573_v55 = vpop.f32.mrb[1].mxu1 }
  0xf9   :  { %v398_v56 = vadd.f32 %v552_v51, %v488_v49  ;;  %v574_v57 = vadd.f32 %v573_v55, %v572_v53  ;;  %v575_v58 = vpop.f32.mrb[2].mxu1 }
  0xfa   :  { %v576_v59 = vpop.f32.mrb[3].mxu1 }
  0xfb   :  { %v438_v60 = vadd.f32 %v574_v57, %v398_v56 }
 0x115   :  { %v477_v61 = vpop.f32.mrb[4].mxu0 }
 0x116   :  { %v478_v62 = vadd.f32 %v477_v61, %v438_v60  ;;  %v605_v63 = vpop.f32.mrb[5].mxu0 }
 0x117   :  { %v480_v0 = vpop.f32.mrb[6].mxu0 }
 0x118   :  { %483 = vst [vmem:[%s814_s3] sm:$0xff] %v478_v62  ;;  %v606_v1 = vpop.f32.mrb[7].mxu0 }

</bundles_post_ra>
